<compile_context>
chip_gen: v6e
topology: v6e:2x2x1
jax: 0.10.0
libtpu: 0.0.40
codegen_flags: <defaults>
</compile_context>

<pallas_src>
import functools

import jax
import jax.numpy as jnp
from jax.experimental import pallas as pl
from jax.experimental.pallas import tpu as pltpu

_CLS_PAD = 128   # classifier output lanes (sliced to num_classes after the final resize)
_IN_PAD = 8      # RGB channels padded 3 -> 8 once at the input


def _pick_tile(dim, choices):
    for c in choices:
        if dim % c == 0:
            return c
    return dim


# ----------------------------------------------------------------------------
# Kernel 1: fused matmul  O = act(A @ B + bias)     (1x1 convs / classifier)
# ----------------------------------------------------------------------------
def _matmul_bias_act_kernel(a_ref, b_ref, bias_ref, o_ref, acc_ref, *, relu):
    @pl.when(pl.program_id(2) == 0)
    def _():
        acc_ref[...] = jnp.zeros_like(acc_ref)

    acc_ref[...] += jnp.dot(a_ref[...], b_ref[...],
                            preferred_element_type=jnp.float32)

    @pl.when(pl.program_id(2) == pl.num_programs(2) - 1)
    def _():
        y = acc_ref[...] + bias_ref[...]
        if relu:
            y = jnp.maximum(y, 0.0)
        o_ref[...] = y.astype(o_ref.dtype)


def fused_matmul(a, b, bias, relu, out_dtype=jnp.bfloat16):
    """act((M,K) @ (K,N) + bias(1,N)).  b is bf16 with the BN scale pre-folded."""
    M, K = a.shape
    Kb, N = b.shape
    assert Kb == K and M % 8 == 0, (a.shape, b.shape)
    a = a.astype(jnp.bfloat16)

    # Adaptive tiles; full-dim blocks cover odd K/N, so activations are never padded.
    tm = _pick_tile(M, (256, 128, 64, 32, 16, 8))
    if M <= 64 and N == 256:
        tn = 128                                   # keep >=2 parallel N tiles for tiny M
    else:
        tn = _pick_tile(N, (256, 128))
    tk = K if K <= 512 else _pick_tile(K, (512, 256, 128))

    grid = (M // tm, N // tn, K // tk)
    return pl.pallas_call(
        functools.partial(_matmul_bias_act_kernel, relu=relu),
        out_shape=jax.ShapeDtypeStruct((M, N), out_dtype),
        grid_spec=pltpu.PrefetchScalarGridSpec(
            num_scalar_prefetch=0,
            grid=grid,
            in_specs=[
                pl.BlockSpec((tm, tk), lambda i, j, k: (i, k)),
                pl.BlockSpec((tk, tn), lambda i, j, k: (k, j)),
                pl.BlockSpec((1, tn), lambda i, j, k: (0, j)),
            ],
            out_specs=pl.BlockSpec((tm, tn), lambda i, j, k: (i, j)),
            scratch_shapes=[pltpu.VMEM((tm, tn), jnp.float32)],
        ),
        compiler_params=pltpu.CompilerParams(
            dimension_semantics=("parallel", "parallel", "arbitrary")),
    )(a, b, bias)


def conv1x1_bn_act(x, w, bias, relu=True, out_dtype=jnp.bfloat16):
    B, H, W, C = x.shape
    y = fused_matmul(x.reshape(B * H * W, C), w, bias, relu, out_dtype)
    return y.reshape(B, H, W, -1)


# ----------------------------------------------------------------------------
# Kernel 2: dilated 3x3 conv via 9-tap accumulation (no im2col patches tensor)
# ----------------------------------------------------------------------------
def _conv3x3_tap_kernel(xp_hbm, w_ref, bias_ref, o_ref, xbuf, acc_ref, sem,
                        *, d, B, H, W, relu):
    t = pl.program_id(1)                 # tap index 0..8 (reduction axis)
    kh = t // 3
    kw = t - kh * 3

    @pl.when(t == 0)
    def _():
        acc_ref[...] = jnp.zeros_like(acc_ref)

    # DMA the shifted (dilated) window for this tap straight from HBM into a flat
    # (B*H*W, C) VMEM slab -- one contiguous (W, C) band per (batch, output row).
    copies = []
    for b in range(B):
        for h in range(H):
            cp = pltpu.make_async_copy(
                xp_hbm.at[b, kh * d + h, pl.ds(kw * d, W), :],
                xbuf.at[pl.ds((b * H + h) * W, W), :],
                sem)
            cp.start()
            copies.append(cp)
    for cp in copies:
        cp.wait()

    acc_ref[...] += jnp.dot(xbuf[...], w_ref[0],
                            preferred_element_type=jnp.float32)

    @pl.when(t == pl.num_programs(1) - 1)
    def _():
        y = acc_ref[...] + bias_ref[...]
        if relu:
            y = jnp.maximum(y, 0.0)
        o_ref[...] = y.astype(o_ref.dtype)


def conv3x3_bn_act(x, w9, bias, dilation=1, relu=True, out_dtype=jnp.bfloat16):
    """3x3 conv, stride 1, padding == dilation (torchvision ASPP / decoder semantics)."""
    B, H, W, C = x.shape
    N = w9.shape[-1]
    d = dilation
    xp = jnp.pad(x.astype(jnp.bfloat16), ((0, 0), (d, d), (d, d), (0, 0)))
    M = B * H * W
    tn = _pick_tile(N, (256, 128))
    grid = (N // tn, 9)
    # TODO(synk): double-buffer the per-tap window DMA for large spatial sizes.
    out = pl.pallas_call(
        functools.partial(_conv3x3_tap_kernel, d=d, B=B, H=H, W=W, relu=relu),
        out_shape=jax.ShapeDtypeStruct((M, N), out_dtype),
        grid_spec=pltpu.PrefetchScalarGridSpec(
            num_scalar_prefetch=0,
            grid=grid,
            in_specs=[
                pl.BlockSpec(memory_space=pl.ANY),                # padded input stays in HBM
                pl.BlockSpec((1, C, tn), lambda j, t: (t, 0, j)),  # per-tap weight slice
                pl.BlockSpec((1, tn), lambda j, t: (0, j)),
            ],
            out_specs=pl.BlockSpec((M, tn), lambda j, t: (0, j)),
            scratch_shapes=[
                pltpu.VMEM((M, C), jnp.bfloat16),
                pltpu.VMEM((M, tn), jnp.float32),
                pltpu.SemaphoreType.DMA,
            ],
        ),
        compiler_params=pltpu.CompilerParams(
            dimension_semantics=("parallel", "arbitrary")),
    )(xp, w9, bias)
    return out.reshape(B, H, W, N)


# ----------------------------------------------------------------------------
# Kernel 3: 2-tap lerp (VPU) for bilinear interpolation
# ----------------------------------------------------------------------------
def _lerp_kernel(a_ref, b_ref, w_ref, o_ref):
    w = w_ref[...]                                   # (tm, 1) f32, weight of the hi tap
    a = a_ref[...].astype(jnp.float32)
    b = b_ref[...].astype(jnp.float32)
    o_ref[...] = (a + w * (b - a)).astype(o_ref.dtype)


def _lerp_rows(a, b, w, out_dtype):
    M, D = a.shape
    tm = _pick_tile(M, (256, 128, 64, 32, 16, 8))
    td = _pick_tile(D, (512, 256, 128))
    grid = (M // tm, D // td)
    return pl.pallas_call(
        _lerp_kernel,
        out_shape=jax.ShapeDtypeStruct((M, D), out_dtype),
        grid_spec=pltpu.PrefetchScalarGridSpec(
            num_scalar_prefetch=0,
            grid=grid,
            in_specs=[
                pl.BlockSpec((tm, td), lambda i, j: (i, j)),
                pl.BlockSpec((tm, td), lambda i, j: (i, j)),
                pl.BlockSpec((tm, 1), lambda i, j: (i, 0)),
            ],
            out_specs=pl.BlockSpec((tm, td), lambda i, j: (i, j)),
        ),
        compiler_params=pltpu.CompilerParams(
            dimension_semantics=("parallel", "parallel")),
    )(a, b, w.reshape(M, 1).astype(jnp.float32))


def _lerp_coords(in_size, out_size):
    """align_corners=False 1-D source coords: clamp, floor, weight of the hi tap."""
    o = jnp.arange(out_size, dtype=jnp.float32)
    src = jnp.maximum((o + 0.5) * (in_size / out_size) - 0.5, 0.0)
    lo = jnp.minimum(jnp.floor(src).astype(jnp.int32), in_size - 1)
    hi = jnp.minimum(lo + 1, in_size - 1)
    w_hi = src - lo.astype(jnp.float32)
    return lo, hi, w_hi


def bilinear_resize(x, out_h, out_w, out_dtype=None):
    """F.interpolate(mode='bilinear', align_corners=False) as two separable VPU lerps."""
    B, H, W, C = x.shape
    out_dtype = out_dtype or x.dtype
    lo, hi, wh = _lerp_coords(H, out_h)
    a = jnp.take(x, lo, axis=1).reshape(B * out_h, W * C)
    b = jnp.take(x, hi, axis=1).reshape(B * out_h, W * C)
    y = _lerp_rows(a, b, jnp.tile(wh, B), out_dtype).reshape(B, out_h, W, C)

    lo, hi, ww = _lerp_coords(W, out_w)
    a = jnp.take(y, lo, axis=2).reshape(B * out_h * out_w, C)
    b = jnp.take(y, hi, axis=2).reshape(B * out_h * out_w, C)
    z = _lerp_rows(a, b, jnp.tile(ww, B * out_h), out_dtype)
    return z.reshape(B, out_h, out_w, C)


def _avgpool(x, k):
    B, H, W, C = x.shape
    return (x.astype(jnp.float32)
            .reshape(B, H // k, k, W // k, k, C).mean(axis=(2, 4))
            .astype(jnp.bfloat16))


# ----------------------------------------------------------------------------
# Parameters (deterministic synthetic init; eval-mode BN folded: running stats (0,1)
# so the per-channel scale gamma/sqrt(1+eps) is pre-multiplied into the weights).
# ----------------------------------------------------------------------------
def init_params(key, num_classes):
    keys = iter(jax.random.split(key, 64))

    def w(shape, std=0.02):
        return std * jax.random.normal(next(keys), shape, jnp.float32)

    def bn(c):
        gamma = 1.0 + 0.01 * jax.random.normal(next(keys), (c,), jnp.float32)
        beta = 0.01 * jax.random.normal(next(keys), (c,), jnp.float32)
        scale = gamma / jnp.sqrt(1.0 + 1e-5)
        return scale, beta

    def conv1x1(cin, cout):
        wt = w((cin, cout))
        scale, beta = bn(cout)
        return (wt * scale[None, :]).astype(jnp.bfloat16), beta.reshape(1, cout)

    def conv3x3(cin, cout):
        wt = w((3, 3, cin, cout))
        scale, beta = bn(cout)
        wt = (wt * scale[None, None, None, :]).reshape(9, cin, cout)
        return wt.astype(jnp.bfloat16), beta.reshape(1, cout)

    p = {}
    # synthetic backbone stub (see TODO in forward); input channels padded 3 -> _IN_PAD once
    w1, b1 = conv1x1(3, 256)
    p["bb1_w"] = jnp.zeros((_IN_PAD, 256), jnp.bfloat16).at[:3].set(w1)
    p["bb1_b"] = b1
    p["bb2_w"], p["bb2_b"] = conv1x1(256, 2048)
    # ASPP: 2048 -> 256 (1x1), rates 6/12/18 (3x3), pooling branch, 1280 -> 256 projection
    p["aspp0_w"], p["aspp0_b"] = conv1x1(2048, 256)
    for i in range(1, 4):
        p[f"aspp{i}_w"], p[f"aspp{i}_b"] = conv3x3(2048, 256)
    p["aspp_pool_w"], p["aspp_pool_b"] = conv1x1(2048, 256)
    p["aspp_proj_w"], p["aspp_proj_b"] = conv1x1(1280, 256)
    # Decoder
    p["frm_w"], p["frm_b"] = conv1x1(256, 48)
    p["dec1_w"], p["dec1_b"] = conv3x3(256 + 48, 256)
    p["dec2_w"], p["dec2_b"] = conv3x3(256, 256)
    # Classifier, output lanes padded num_classes -> _CLS_PAD once (lane-dense stores).
    cls_w = w((256, num_classes))
    cls_b = 0.01 * jax.random.normal(next(keys), (num_classes,), jnp.float32)
    p["cls_w"] = (jnp.zeros((256, _CLS_PAD), jnp.float32)
                  .at[:, :num_classes].set(cls_w)).astype(jnp.bfloat16)
    p["cls_b"] = jnp.zeros((1, _CLS_PAD), jnp.float32).at[:, :num_classes].set(
        cls_b.reshape(1, num_classes))
    return p


# ----------------------------------------------------------------------------
# DeepLabv3plus forward (output_stride=16, eval mode)
# ----------------------------------------------------------------------------
def deeplabv3plus_forward(x_nchw, p, num_classes):
    x = jnp.transpose(x_nchw, (0, 2, 3, 1)).astype(jnp.bfloat16)     # NCHW -> NHWC
    B, H, W, Cin = x.shape
    x = jnp.pad(x, ((0, 0), (0, 0), (0, 0), (0, _IN_PAD - Cin)))     # pad 3 -> 8 lanes once

    # --- backbone ---
    # TODO(synk): full ResNet101/Xception backbone (external module) not replicated;
    # synthetic stride-16 backbone with the correct feature shapes / hook semantics.
    low_in = _avgpool(x, 4)                                          # stride 4
    low_level = conv1x1_bn_act(low_in, p["bb1_w"], p["bb1_b"])       # (B,H/4,W/4,256)
    high_in = _avgpool(low_level, 4)                                 # stride 16
    feat = conv1x1_bn_act(high_in, p["bb2_w"], p["bb2_b"])           # (B,H/16,W/16,2048)

    # --- ASPP ---
    branches = [conv1x1_bn_act(feat, p["aspp0_w"], p["aspp0_b"])]
    for i, rate in enumerate((6, 12, 18)):
        branches.append(conv3x3_bn_act(feat, p[f"aspp{i+1}_w"], p[f"aspp{i+1}_b"],
                                       dilation=rate))
    Bh, Hh, Wh, _ = feat.shape
    # Global-pool branch: M == batch -> too small for a pallas launch; plain jnp (per
    # perf review).  Bilinear upsample of a 1x1 map == broadcast.
    pooled = feat.astype(jnp.float32).mean(axis=(1, 2))              # (B, 2048)
    pooled = jnp.maximum(
        jnp.dot(pooled, p["aspp_pool_w"].astype(jnp.float32)) + p["aspp_pool_b"], 0.0)
    branches.append(jnp.broadcast_to(
        pooled.astype(jnp.bfloat16).reshape(Bh, 1, 1, 256), (Bh, Hh, Wh, 256)))
    cat = jnp.concatenate(branches, axis=-1)                         # (B,Hh,Wh,1280)
    aspp_out = conv1x1_bn_act(cat, p["aspp_proj_w"], p["aspp_proj_b"])
    # Dropout(0.5) in the ASPP projection is identity in eval mode.

    # --- Decoder ---
    low_ref = conv1x1_bn_act(low_level, p["frm_w"], p["frm_b"])      # (B,H/4,W/4,48)
    xd = bilinear_resize(aspp_out, low_ref.shape[1], low_ref.shape[2])
    xd = jnp.concatenate([xd, low_ref], axis=-1)                     # channels [x, low] = 304
    xd = conv3x3_bn_act(xd, p["dec1_w"], p["dec1_b"], dilation=1)
    xd = conv3x3_bn_act(xd, p["dec2_w"], p["dec2_b"], dilation=1)

    # --- classifier (128 padded lanes) + final upsample; slice lanes only at the end ---
    Bl, Hl, Wl, _ = xd.shape
    logits = fused_matmul(xd.reshape(Bl * Hl * Wl, 256), p["cls_w"], p["cls_b"],
                          relu=False, out_dtype=jnp.float32)
    logits = logits.reshape(Bl, Hl, Wl, _CLS_PAD)
    out = bilinear_resize(logits, H, W, out_dtype=jnp.float32)       # (B,H,W,_CLS_PAD)
    out = out[..., :num_classes]
    return jnp.transpose(out, (0, 3, 1, 2))                          # back to NCHW


if __name__ == "__main__":
    key = jax.random.PRNGKey(0)
    pkey, xkey = jax.random.split(key)
    num_classes = 4
    params = init_params(pkey, num_classes)

    # PyTorch-style NCHW input, output_stride=16 consistent shapes.
    x = jax.random.normal(xkey, (2, 3, 32, 32), jnp.float32)

    out = deeplabv3plus_forward(x, params, num_classes)
    out = jax.block_until_ready(out)
    assert out.shape == (2, num_classes, 32, 32), out.shape
    assert bool(jnp.all(jnp.isfinite(out)))
    print("KERNEL_OK")
</pallas_src>

<mosaic_0001>
module attributes {stable_mosaic.version = 11 : i64} {
  func.func @_matmul_bias_act_kernel(%arg0: i32, %arg1: i32, %arg2: i32, %arg3: memref<128x8xbf16, #tpu.memory_space<vmem>>, %arg4: memref<8x256xbf16, #tpu.memory_space<vmem>>, %arg5: memref<1x256xf32, #tpu.memory_space<vmem>>, %arg6: memref<128x256xbf16, #tpu.memory_space<vmem>>, %arg7: memref<128x256xf32, #tpu.memory_space<vmem>>) attributes {dimension_semantics = [#tpu.dimension_semantics<parallel>, #tpu.dimension_semantics<parallel>, #tpu.dimension_semantics<arbitrary>], iteration_bounds = array<i64: 1, 1, 1>, scalar_prefetch = 0 : i64, scratch_operands = 1 : i64, tpu.core_type = #tpu.core_type<tc>, window_params = [{transform_indices = @transform_0, window_bounds = array<i64: 128, 8>}, {transform_indices = @transform_1, window_bounds = array<i64: 8, 256>}, {transform_indices = @transform_2, window_bounds = array<i64: 1, 256>}, {transform_indices = @transform_3, window_bounds = array<i64: 128, 256>}]} {
    %c0_i32 = arith.constant 0 : i32
    %0 = arith.cmpi eq, %arg2, %c0_i32 : i32
    %1 = arith.extui %0 : i1 to i32
    %c0_i32_0 = arith.constant 0 : i32
    %2 = arith.cmpi ne, %1, %c0_i32_0 : i32
    scf.if %2 {
      %cst_10 = arith.constant 0.000000e+00 : f32
      %12 = vector.broadcast %cst_10 : f32 to vector<128x256xf32>
      %c0_11 = arith.constant 0 : index
      %c0_12 = arith.constant 0 : index
      %13 = vector.load %arg7[%c0_11, %c0_12] : memref<128x256xf32, #tpu.memory_space<vmem>>, vector<128x256xf32>
      tpu.vector_store %arg7[%c0_11, %c0_12], %12 {strides = array<i32>} : memref<128x256xf32, #tpu.memory_space<vmem>>, vector<128x256xf32>,
    } else {
    }
    %c0 = arith.constant 0 : index
    %c0_1 = arith.constant 0 : index
    %3 = vector.load %arg7[%c0, %c0_1] : memref<128x256xf32, #tpu.memory_space<vmem>>, vector<128x256xf32>
    %c0_2 = arith.constant 0 : index
    %c0_3 = arith.constant 0 : index
    %4 = vector.load %arg3[%c0_2, %c0_3] : memref<128x8xbf16, #tpu.memory_space<vmem>>, vector<128x8xbf16>
    %c0_4 = arith.constant 0 : index
    %c0_5 = arith.constant 0 : index
    %5 = vector.load %arg4[%c0_4, %c0_5] : memref<8x256xbf16, #tpu.memory_space<vmem>>, vector<8x256xbf16>
    %cst = arith.constant dense<0.000000e+00> : vector<128x256xf32>
    %6 = tpu.matmul %4, %5, %cst {dimension_numbers = #tpu.dot_dimension_numbers<[1], [0], [0], [1], [0, 0, 1, 1], [], []>} : vector<128x8xbf16>, vector<8x256xbf16>, vector<128x256xf32> -> vector<128x256xf32>
    %7 = arith.addf %3, %6 : vector<128x256xf32>
    %c0_6 = arith.constant 0 : index
    %c0_7 = arith.constant 0 : index
    %8 = vector.load %arg7[%c0_6, %c0_7] : memref<128x256xf32, #tpu.memory_space<vmem>>, vector<128x256xf32>
    tpu.vector_store %arg7[%c0_6, %c0_7], %7 {strides = array<i32>} : memref<128x256xf32, #tpu.memory_space<vmem>>, vector<128x256xf32>,
    %c0_i32_8 = arith.constant 0 : i32
    %9 = arith.cmpi eq, %arg2, %c0_i32_8 : i32
    %10 = arith.extui %9 : i1 to i32
    %c0_i32_9 = arith.constant 0 : i32
    %11 = arith.cmpi ne, %10, %c0_i32_9 : i32
    scf.if %11 {
      %c0_10 = arith.constant 0 : index
      %c0_11 = arith.constant 0 : index
      %12 = vector.load %arg7[%c0_10, %c0_11] : memref<128x256xf32, #tpu.memory_space<vmem>>, vector<128x256xf32>
      %c0_12 = arith.constant 0 : index
      %c0_13 = arith.constant 0 : index
      %13 = vector.load %arg5[%c0_12, %c0_13] : memref<1x256xf32, #tpu.memory_space<vmem>>, vector<1x256xf32>
      %14 = vector.broadcast %13 : vector<1x256xf32> to vector<128x256xf32>
      %15 = arith.addf %12, %14 : vector<128x256xf32>
      %cst_14 = arith.constant 0.000000e+00 : f32
      %16 = vector.broadcast %cst_14 : f32 to vector<128x256xf32>
      %17 = arith.maximumf %15, %16 : vector<128x256xf32>
      %18 = arith.truncf %17 : vector<128x256xf32> to vector<128x256xbf16>
      %c0_15 = arith.constant 0 : index
      %c0_16 = arith.constant 0 : index
      %19 = vector.load %arg6[%c0_15, %c0_16] : memref<128x256xbf16, #tpu.memory_space<vmem>>, vector<128x256xbf16>
      tpu.vector_store %arg6[%c0_15, %c0_16], %18 {strides = array<i32>} : memref<128x256xbf16, #tpu.memory_space<vmem>>, vector<128x256xbf16>,
    } else {
    }
    return
  }
  func.func @transform_0(%arg0: i32, %arg1: i32, %arg2: i32) -> (i32, i32) {
    %c0_i32 = arith.constant 0 : i32
    return %arg0, %arg2 : i32, i32
  }
  func.func @transform_1(%arg0: i32, %arg1: i32, %arg2: i32) -> (i32, i32) {
    %c0_i32 = arith.constant 0 : i32
    return %arg2, %arg1 : i32, i32
  }
  func.func @transform_2(%arg0: i32, %arg1: i32, %arg2: i32) -> (i32, i32) {
    %c0_i32 = arith.constant 0 : i32
    %c0_i32_0 = arith.constant 0 : i32
    return %c0_i32, %arg1 : i32, i32
  }
  func.func @transform_3(%arg0: i32, %arg1: i32, %arg2: i32) -> (i32, i32) {
    %c0_i32 = arith.constant 0 : i32
    return %arg0, %arg1 : i32, i32
  }
}

</mosaic_0001>

<bundles_post_ra>
// kernel: tpu_custom_call.1
= control target key start
LH: loop header
LB: loop body
LE: loop exit
PB: predicated region body
PF: predicated region fallthrough
CT: control target
= control target key end

     0   :  { %vm171_vm0 = vcmask 1043456   ;;  %v683_v3 = vmov 0   ;;  %vm146_vm1 = vcmask 64512   ;;  %s784_s0 = inlined_call_operand.vmem [shape: bf16[128,8], index: 0, kind: input, shape index: {}]   ;;  %s785_s1 = inlined_call_operand.vmem [shape: bf16[8,256], index: 1, kind: input, shape index: {}]   ;;  %s786_s2 = inlined_call_operand.vmem [shape: f32[1,256], index: 2, kind: input, shape index: {}]   ;;  %s787_s3 = inlined_call_operand.hbm [shape: bf16[128,256], index: 3, kind: output, shape index: {}]  }
   0x1   :  { %v100_v0 = vld [vmem:[%s785_s1] sm:$0xff]  ;;  %210 = vmatprep.mubr.bf16.mxu0 %v683_v3  ;;  %250 = vmatprep.mubr.bf16.mxu1 %v683_v3 }
   0x2   :  { %v603_v1 = vcombine.high %v100_v0, %v100_v0  ;;  %v602_v2 = vcombine.low %v100_v0, %v100_v0  ;;  %v653_v4 = vld [vmem:[%s784_s0] sm:$0xff]  }
   0x3   :  { %v654_v6 = vld [vmem:[%s784_s0 + $0x20] sm:$0xff]  }
   0x4   :  { %604 = vmatprep.subr.msk.bf16.mxu0 %vm171_vm0, %v603_v1  ;;  %645 = vmatprep.subr.msk.bf16.mxu1 %vm171_vm0, %v603_v1  ;;  %v173_v5 = vsel %vm171_vm0, %v602_v2, 0 }
   0x5   :  { %193 = vmatpush1.bf16.msra.mxu0 %v173_v5  ;;  %646 = vmatpush1.bf16.msra.mxu1 %v173_v5 }
   0x8   :  { %605 = vmatmul.mubr.msk.bf16.vlgmr.msra.gmra.mxu0 %vm146_vm1, %v653_v4  ;;  %609 = vmatmul.mubr.msk.bf16.vlgmr.msra.gmra.mxu1 %vm146_vm1, %v654_v6 }
   0x9   :  { %220 = vmatprep.mubr.bf16.mxu0 %v683_v3  ;;  %260 = vmatprep.mubr.bf16.mxu1 %v683_v3 }
   0xa   :  { %8 = vsyncpa [#allocation4], 0  ;;  %v655_v7 = vld [vmem:[%s784_s0 + $0x8] sm:$0xff]   ;;  %v657_v9 = vld [vmem:[%s784_s0 + $0x10] sm:$0xff]   ;;  %v392_v13 = vlaneseq }
   0xb   :  { %v656_v8 = vld [vmem:[%s784_s0 + $0x28] sm:$0xff]   ;;  %v658_v10 = vld [vmem:[%s784_s0 + $0x30] sm:$0xff]   ;;  %v659_v11 = vld [vmem:[%s784_s0 + $0x18] sm:$0xff]  }
   0xc   :  { %v660_v12 = vld [vmem:[%s784_s0 + $0x38] sm:$0xff]   ;;  %v393_v14 = vshrl.u32 %v392_v13, 7  ;;  %v390_v16 = vld [vmem:[%s786_s2] sm:$0x3]  ;;  %s684_s0 = smov [#allocation3]  }
   0xd   :  { %s583_s2 = sshll.u32 %s684_s0, 4  ;;  %s584_s2 = int_to_ptr.vmem [resolvable:$true] %s583_s2 }
   0xe   :  { %v394_v15 = vsub.s32 0, %v393_v14  ;;  %v398_v17 = vsub.s32 1, %v393_v14  ;;  %s661_s4 = scalar_lea.vmem %s584_s2, 2048  ;;  %p666_p1 = scmp.lt.s32.totalorder %s584_s2, %s584_s2 }
   0xf   :  { %p662_p0 = scmp.ne.s32.totalorder %s584_s2, %s661_s4  ;;  %p667_p2 = scmp.lt.s32.totalorder %s661_s4, %s661_s4 }
  0x10   :  { %606 = vmatmul.mubr.msk.bf16.gmra.mxu0 %vm146_vm1, %v655_v7  ;;  %610 = vmatmul.mubr.msk.bf16.gmra.mxu1 %vm146_vm1, %v656_v8  ;;  %v745_v18 = vrot.slane %v390_v16, %v394_v15  ;;  %v747_v19 = vrot.slane %v390_v16, %v398_v17 }
  0x11   :  { %230 = vmatprep.mubr.bf16.mxu0 %v683_v3  ;;  %270 = vmatprep.mubr.bf16.mxu1 %v683_v3  ;;  %p668_p3 = por %p667_p2, %p666_p1 }
  0x13   :  { %p669_p4 = pnand %p668_p3, %p662_p0 }
  0x18   :  { %607 = vmatmul.mubr.msk.bf16.gmra.mxu0 %vm146_vm1, %v657_v9  ;;  %611 = vmatmul.mubr.msk.bf16.gmra.mxu1 %vm146_vm1, %v658_v10 }
  0x19   :  { %240 = vmatprep.mubr.bf16.mxu0 %v683_v3  ;;  %280 = vmatprep.mubr.bf16.mxu1 %v683_v3 }
  0x20   :  { %608 = vmatmul.mubr.msk.bf16.gmra.mxu0 %vm146_vm1, %v659_v11  ;;  %612 = vmatmul.mubr.msk.bf16.gmra.mxu1 %vm146_vm1, %v660_v12 }
  0xc8   :  { %v212_v20 = vpop.f32.mrf.mxu0  ;;  %v252_v21 = vpop.f32.mrf.mxu1 }
  0xc9   :  { %v402_v22 = vadd.f32 %v745_v18, %v212_v20  ;;  %v418_v23 = vadd.f32 %v745_v18, %v252_v21 }
  0xca   :  { %v214_v24 = vpop.f32.mrf.mxu0  ;;  %v254_v25 = vpop.f32.mrf.mxu1 }
  0xcb   :  { %v403_v26 = vadd.f32 %v747_v19, %v214_v24  ;;  %v419_v27 = vadd.f32 %v747_v19, %v254_v25  ;;  %v434_v30 = vmax.f32 %v402_v22, 0.0  ;;  %v450_v31 = vmax.f32 %v418_v23, 0.0 }
  0xcc   :  { %v216_v28 = vpop.f32.mrf.mxu0  ;;  %v256_v29 = vpop.f32.mrf.mxu1 }
  0xcd   :  { %v435_v32 = vmax.f32 %v403_v26, 0.0  ;;  %v451_v33 = vmax.f32 %v419_v27, 0.0  ;;  %v404_v34 = vadd.f32 %v745_v18, %v216_v28  ;;  %v420_v35 = vadd.f32 %v745_v18, %v256_v29 }
  0xce   :  { %v218_v36 = vpop.f32.mrf.mxu0  ;;  %v258_v37 = vpop.f32.mrf.mxu1 }
  0xcf   :  { %v629_v38 = vpack.c.bf16 %v435_v32, %v434_v30  ;;  %v637_v39 = vpack.c.bf16 %v451_v33, %v450_v31  ;;  %v405_v40 = vadd.f32 %v747_v19, %v218_v36  ;;  %v421_v41 = vadd.f32 %v747_v19, %v258_v37 }
  0xd0   :  { %v222_v42 = vpop.f32.mrf.mxu0  ;;  %v262_v43 = vpop.f32.mrf.mxu1  ;;  %v436_v46 = vmax.f32 %v404_v34, 0.0  ;;  %v452_v47 = vmax.f32 %v420_v35, 0.0 }
  0xd1   :  { %562 = vst [vmem:[#allocation3] sm:$0xff] %v629_v38  ;;  %570 = vst [vmem:[#allocation3 + $0x40] sm:$0xff] %v637_v39  ;;  %v406_v44 = vadd.f32 %v745_v18, %v222_v42  ;;  %v422_v45 = vadd.f32 %v745_v18, %v262_v43  ;;  %v437_v48 = vmax.f32 %v405_v40, 0.0  ;;  %v453_v49 = vmax.f32 %v421_v41, 0.0 }
  0xd2   :  { %v224_v50 = vpop.f32.mrf.mxu0  ;;  %v264_v51 = vpop.f32.mrf.mxu1 }
  0xd3   :  { %v407_v52 = vadd.f32 %v747_v19, %v224_v50  ;;  %v423_v53 = vadd.f32 %v747_v19, %v264_v51  ;;  %v630_v54 = vpack.c.bf16 %v437_v48, %v436_v46  ;;  %v638_v55 = vpack.c.bf16 %v453_v49, %v452_v47 }
  0xd4   :  { %v226_v56 = vpop.f32.mrf.mxu0  ;;  %v266_v57 = vpop.f32.mrf.mxu1  ;;  %v438_v58 = vmax.f32 %v406_v44, 0.0  ;;  %v454_v59 = vmax.f32 %v422_v45, 0.0 }
  0xd5   :  { %v439_v60 = vmax.f32 %v407_v52, 0.0  ;;  %v455_v61 = vmax.f32 %v423_v53, 0.0  ;;  %563 = vst [vmem:[#allocation3 + $0x8] sm:$0xff] %v630_v54  ;;  %571 = vst [vmem:[#allocation3 + $0x48] sm:$0xff] %v638_v55  ;;  %v408_v62 = vadd.f32 %v745_v18, %v226_v56  ;;  %v424_v63 = vadd.f32 %v745_v18, %v266_v57 }
  0xd6   :  { %v228_v0 = vpop.f32.mrf.mxu0  ;;  %v268_v1 = vpop.f32.mrf.mxu1 }
  0xd7   :  { %v631_v2 = vpack.c.bf16 %v439_v60, %v438_v58  ;;  %v639_v3 = vpack.c.bf16 %v455_v61, %v454_v59  ;;  %v409_v4 = vadd.f32 %v747_v19, %v228_v0  ;;  %v425_v5 = vadd.f32 %v747_v19, %v268_v1 }
  0xd8   :  { %v232_v6 = vpop.f32.mrf.mxu0  ;;  %v272_v7 = vpop.f32.mrf.mxu1  ;;  %v440_v10 = vmax.f32 %v408_v62, 0.0  ;;  %v456_v11 = vmax.f32 %v424_v63, 0.0 }
  0xd9   :  { %564 = vst [vmem:[#allocation3 + $0x10] sm:$0xff] %v631_v2  ;;  %572 = vst [vmem:[#allocation3 + $0x50] sm:$0xff] %v639_v3  ;;  %v410_v8 = vadd.f32 %v745_v18, %v232_v6  ;;  %v426_v9 = vadd.f32 %v745_v18, %v272_v7  ;;  %v441_v12 = vmax.f32 %v409_v4, 0.0  ;;  %v457_v13 = vmax.f32 %v425_v5, 0.0 }
  0xda   :  { %v234_v14 = vpop.f32.mrf.mxu0  ;;  %v274_v15 = vpop.f32.mrf.mxu1 }
  0xdb   :  { %v411_v16 = vadd.f32 %v747_v19, %v234_v14  ;;  %v427_v17 = vadd.f32 %v747_v19, %v274_v15  ;;  %v632_v20 = vpack.c.bf16 %v441_v12, %v440_v10  ;;  %v640_v21 = vpack.c.bf16 %v457_v13, %v456_v11 }
  0xdc   :  { %v236_v22 = vpop.f32.mrf.mxu0  ;;  %v276_v23 = vpop.f32.mrf.mxu1  ;;  %v442_v24 = vmax.f32 %v410_v8, 0.0  ;;  %v458_v25 = vmax.f32 %v426_v9, 0.0 }
  0xdd   :  { %v443_v26 = vmax.f32 %v411_v16, 0.0  ;;  %v459_v27 = vmax.f32 %v427_v17, 0.0  ;;  %565 = vst [vmem:[#allocation3 + $0x18] sm:$0xff] %v632_v20  ;;  %573 = vst [vmem:[#allocation3 + $0x58] sm:$0xff] %v640_v21  ;;  %v412_v28 = vadd.f32 %v745_v18, %v236_v22  ;;  %v428_v29 = vadd.f32 %v745_v18, %v276_v23 }
  0xde   :  { %v238_v30 = vpop.f32.mrf.mxu0  ;;  %v278_v31 = vpop.f32.mrf.mxu1 }
  0xdf   :  { %v633_v32 = vpack.c.bf16 %v443_v26, %v442_v24  ;;  %v641_v33 = vpack.c.bf16 %v459_v27, %v458_v25  ;;  %v413_v34 = vadd.f32 %v747_v19, %v238_v30  ;;  %v429_v35 = vadd.f32 %v747_v19, %v278_v31 }
  0xe0   :  { %v242_v36 = vpop.f32.mrf.mxu0  ;;  %v282_v37 = vpop.f32.mrf.mxu1  ;;  %v444_v40 = vmax.f32 %v412_v28, 0.0  ;;  %v460_v41 = vmax.f32 %v428_v29, 0.0 }
  0xe1   :  { %566 = vst [vmem:[#allocation3 + $0x20] sm:$0xff] %v633_v32  ;;  %574 = vst [vmem:[#allocation3 + $0x60] sm:$0xff] %v641_v33  ;;  %v414_v38 = vadd.f32 %v745_v18, %v242_v36  ;;  %v430_v39 = vadd.f32 %v745_v18, %v282_v37  ;;  %v445_v42 = vmax.f32 %v413_v34, 0.0  ;;  %v461_v43 = vmax.f32 %v429_v35, 0.0 }
  0xe2   :  { %v244_v44 = vpop.f32.mrf.mxu0  ;;  %v284_v45 = vpop.f32.mrf.mxu1 }
  0xe3   :  { %v415_v46 = vadd.f32 %v747_v19, %v244_v44  ;;  %v431_v47 = vadd.f32 %v747_v19, %v284_v45  ;;  %v634_v48 = vpack.c.bf16 %v445_v42, %v444_v40  ;;  %v642_v49 = vpack.c.bf16 %v461_v43, %v460_v41 }
  0xe4   :  { %v246_v50 = vpop.f32.mrf.mxu0  ;;  %v286_v51 = vpop.f32.mrf.mxu1  ;;  %v446_v52 = vmax.f32 %v414_v38, 0.0  ;;  %v462_v53 = vmax.f32 %v430_v39, 0.0 }
  0xe5   :  { %v447_v54 = vmax.f32 %v415_v46, 0.0  ;;  %v463_v55 = vmax.f32 %v431_v47, 0.0  ;;  %567 = vst [vmem:[#allocation3 + $0x28] sm:$0xff] %v634_v48  ;;  %575 = vst [vmem:[#allocation3 + $0x68] sm:$0xff] %v642_v49  ;;  %v416_v56 = vadd.f32 %v745_v18, %v246_v50  ;;  %v432_v57 = vadd.f32 %v745_v18, %v286_v51 }
  0xe6   :  { %v248_v58 = vpop.f32.mrf.mxu0  ;;  %v288_v59 = vpop.f32.mrf.mxu1 }
  0xe7   :  { %v635_v60 = vpack.c.bf16 %v447_v54, %v446_v52  ;;  %v643_v61 = vpack.c.bf16 %v463_v55, %v462_v53  ;;  %v417_v62 = vadd.f32 %v747_v19, %v248_v58  ;;  %v433_v63 = vadd.f32 %v747_v19, %v288_v59 }
  0xe8   :  { %v448_v0 = vmax.f32 %v416_v56, 0.0  ;;  %v464_v1 = vmax.f32 %v432_v57, 0.0 }
  0xe9   :  { %568 = vst [vmem:[#allocation3 + $0x30] sm:$0xff] %v635_v60  ;;  %576 = vst [vmem:[#allocation3 + $0x70] sm:$0xff] %v643_v61  ;;  %v449_v2 = vmax.f32 %v417_v62, 0.0  ;;  %v465_v3 = vmax.f32 %v433_v63, 0.0 }
  0xeb   :  { %v636_v4 = vpack.c.bf16 %v449_v2, %v448_v0  ;;  %v644_v5 = vpack.c.bf16 %v465_v3, %v464_v1 }
  0xed   :  { %569 = vst [vmem:[#allocation3 + $0x38] sm:$0xff] %v636_v4  ;;  %577 = vst [vmem:[#allocation3 + $0x78] sm:$0xff] %v644_v5 }
  0xee   :  { %672 = shalt.err (!%p669_p4)
}
  0xef   :  { %s685_s5 = smov 128   ;;  %s686_s6 = smov 8  }
  0xf0   :  { %589 = dma.vmem_to_hbm [thread:$0]  %s584_s2, 2048, %s787_s3, [#allocation4], %s685_s5, %s685_s5, %s686_s6  }
  0xf1   :  { %681 = dma.done.wait [#allocation4], 2048  }
  0xf2   :  { %682 = vsyncadd [#allocation4], 4294965248 }
  0xf3   :  { %593 = vsyncpa [#allocation4], 1 }

</bundles_post_ra>
